<compile_context>
chip_gen: v7x
topology: tpu7x:2x2x1
jax: 0.10.0
libtpu: 0.0.40
codegen_flags: <defaults>
</compile_context>

<pallas_src>
import jax
import jax.numpy as jnp
from jax.experimental import pallas as pl
from jax.experimental.pallas import tpu as pltpu

_LANES = 128
_MAX_BLOCK_ROWS = 1024  # 1024x128 f32 = 512 KiB per tile; fits all generations


def _relu_kernel(x_ref, o_ref):
    # Elementwise max(x, 0) on the VPU; scalar 0.0 broadcast (no zero tile).
    o_ref[...] = jnp.maximum(x_ref[...], 0.0)


def relu_pallas(x: jax.Array) -> jax.Array:
    """Forward of M: ReLU(inplace=True) on an NCHW tensor."""
    orig_shape = x.shape
    total = x.size

    # Lane-dense layout: rows of 128 lanes.
    rows = pl.cdiv(total, _LANES)
    if rows <= _MAX_BLOCK_ROWS:
        # Single block (no pipelining overhead), sublane-aligned (multiple of 8).
        block_rows = ((rows + 7) // 8) * 8
    else:
        block_rows = _MAX_BLOCK_ROWS
    rows_padded = pl.cdiv(rows, block_rows) * block_rows
    padded_total = rows_padded * _LANES

    flat = x.reshape(-1)
    if padded_total != total:
        # Zero padding is safe: ReLU(0) == 0, and we slice it off afterwards.
        flat = jnp.pad(flat, (0, padded_total - total))
    slab = flat.reshape(rows_padded, _LANES)

    grid = (rows_padded // block_rows,)
    out_slab = pl.pallas_call(
        _relu_kernel,
        out_shape=jax.ShapeDtypeStruct(slab.shape, slab.dtype),
        grid=grid,
        in_specs=[pl.BlockSpec((block_rows, _LANES), lambda i: (i, 0))],
        out_specs=pl.BlockSpec((block_rows, _LANES), lambda i: (i, 0)),
        input_output_aliases={0: 0},  # in-place ReLU on the slab
        compiler_params=pltpu.CompilerParams(
            dimension_semantics=("parallel",),  # shard rows across TCs on v7x
        ),
    )(slab)

    return out_slab.reshape(-1)[:total].reshape(orig_shape)


if __name__ == "__main__":
    key = jax.random.PRNGKey(0)
    # Same shape as the PyTorch module's example input: [1, 672, 7, 7]
    x = jax.random.normal(key, (1, 672, 7, 7), dtype=jnp.float32)

    y = relu_pallas(x)
    jax.block_until_ready(y)

    # Correctness check against pure-JAX reference.
    y_ref = jnp.maximum(x, 0.0)
    assert y.shape == x.shape and y.dtype == x.dtype
    assert jnp.array_equal(y, y_ref)

    print("KERNEL_OK")
</pallas_src>

<mosaic_0001>
module attributes {stable_mosaic.version = 11 : i64} {
  func.func @_relu_kernel(%arg0: i32, %arg1: memref<264x128xf32, #tpu.memory_space<vmem>>, %arg2: memref<264x128xf32, #tpu.memory_space<vmem>>) attributes {dimension_semantics = [#tpu.dimension_semantics<parallel>], iteration_bounds = array<i64: 1>, scalar_prefetch = 0 : i64, scratch_operands = 0 : i64, tpu.core_type = #tpu.core_type<tc>, window_params = [{transform_indices = @transform_0, window_bounds = array<i64: 264, 128>}, {transform_indices = @transform_1, window_bounds = array<i64: 264, 128>}]} {
    %c0 = arith.constant 0 : index
    %c0_0 = arith.constant 0 : index
    %0 = vector.load %arg1[%c0, %c0_0] : memref<264x128xf32, #tpu.memory_space<vmem>>, vector<264x128xf32>
    %cst = arith.constant 0.000000e+00 : f32
    %1 = vector.broadcast %cst : f32 to vector<264x128xf32>
    %2 = arith.maximumf %0, %1 : vector<264x128xf32>
    %c0_1 = arith.constant 0 : index
    %c0_2 = arith.constant 0 : index
    %3 = vector.load %arg2[%c0_1, %c0_2] : memref<264x128xf32, #tpu.memory_space<vmem>>, vector<264x128xf32>
    tpu.vector_store %arg2[%c0_1, %c0_2], %2 {strides = array<i32>} : memref<264x128xf32, #tpu.memory_space<vmem>>, vector<264x128xf32>,
    return
  }
  func.func @transform_0(%arg0: i32) -> (i32, i32) {
    %c0_i32 = arith.constant 0 : i32
    %c0_i32_0 = arith.constant 0 : i32
    return %arg0, %c0_i32 : i32, i32
  }
  func.func @transform_1(%arg0: i32) -> (i32, i32) {
    %c0_i32 = arith.constant 0 : i32
    %c0_i32_0 = arith.constant 0 : i32
    return %arg0, %c0_i32 : i32, i32
  }
}

</mosaic_0001>

<bundles_post_ra>
// kernel: tpu_custom_call.1
= control target key start
LH: loop header
LB: loop body
LE: loop exit
PB: predicated region body
PF: predicated region fallthrough
CT: control target
= control target key end

     0   :  { %6 = vsyncpa [#allocation3], 0  ;;  %s238_s0 = inlined_call_operand.hbm [shape: f32[264,128], index: 0, kind: input, shape index: {}, may-alias: {0,1}]   ;;  %s239_s1 = inlined_call_operand.hbm [shape: f32[264,128], index: 1, kind: output, shape index: {}, may-alias: {0,1}]  }
   0x1   :  { %7 = vsyncpa [#allocation4], 0  ;;  %s191_s6 = smov [#allocation2]   ;;  %s143_s10 = scalar_lea.hbm %s238_s0, 4224 }
   0x2   :  { %s13_s7 = sshll.u32 %s191_s6, 4  ;;  %p144_p0 = scmp.ne.s32.totalorder %s238_s0, %s143_s10  ;;  %s14_s7 = int_to_ptr.vmem [resolvable:$true] %s13_s7 }
   0x3   :  { %p147_p1 = scmp.lt.u32.totalorder %s143_s10, %s238_s0 }
   0x5   :  { %p149_p2 = pnand %p147_p1, %p144_p0 }
   0x7   :  { %152 = shalt.err (!%p149_p2)
}
   0x8   :  { %s153_s15 = scalar_lea.vmem %s14_s7, 4224  ;;  %p158_p4 = scmp.lt.s32.totalorder %s14_s7, %s14_s7 }
   0x9   :  { %p154_p3 = scmp.ne.s32.totalorder %s14_s7, %s153_s15  ;;  %p159_p5 = scmp.lt.s32.totalorder %s153_s15, %s153_s15 }
   0xb   :  { %p160_p6 = por %p159_p5, %p158_p4 }
   0xd   :  { %p161_p7 = pnand %p160_p6, %p154_p3 }
   0xf   :  { %164 = shalt.err (!%p161_p7)
}
  0x10   :  { %s192_s16 = smov 128   ;;  %s193_s17 = smov 8  }
  0x11   :  { %19 = dma.hbm_to_vmem [thread:$0]  %s238_s0, 4224, %s14_s7, [#allocation3], %s192_s16, %s192_s16, %s193_s17  }
  0x12   :  { %187 = dma.done.wait [#allocation3], 4224  }
  0x13   :  { %188 = vsyncadd [#allocation3], 4294963072  ;;  %v23_v0 = vld [vmem:[#allocation2] sm:$0xff]  ;;  %v24_v1 = vld [vmem:[#allocation2 + $0x8] sm:$0xff]  ;;  %s194_s20 = smov [#allocation5]  }
  0x14   :  { %v25_v2 = vld [vmem:[#allocation2 + $0x10] sm:$0xff]  ;;  %s220_s21 = sshll.u32 %s194_s20, 4  ;;  %v56_v3 = vmax.f32 %v23_v0, 0.0  ;;  %v57_v4 = vmax.f32 %v24_v1, 0.0  ;;  %v26_v6 = vld [vmem:[#allocation2 + $0x18] sm:$0xff]  ;;  %v27_v7 = vld [vmem:[#allocation2 + $0x20] sm:$0xff]  ;;  %s128_s21 = int_to_ptr.vmem [resolvable:$true] %s220_s21 }
  0x15   :  { %v58_v5 = vmax.f32 %v25_v2, 0.0  ;;  %v28_v8 = vld [vmem:[#allocation2 + $0x28] sm:$0xff]  ;;  %v59_v9 = vmax.f32 %v26_v6, 0.0  ;;  %v60_v10 = vmax.f32 %v27_v7, 0.0  ;;  %v29_v12 = vld [vmem:[#allocation2 + $0x30] sm:$0xff]  ;;  %v30_v13 = vld [vmem:[#allocation2 + $0x38] sm:$0xff]  ;;  %p170_p9 = scmp.lt.s32.totalorder %s128_s21, %s128_s21 }
  0x16   :  { %v61_v11 = vmax.f32 %v28_v8, 0.0  ;;  %v31_v14 = vld [vmem:[#allocation2 + $0x40] sm:$0xff]  ;;  %89 = vst [vmem:[#allocation5] sm:$0xff] %v56_v3  ;;  %90 = vst [vmem:[#allocation5 + $0x8] sm:$0xff] %v57_v4  ;;  %v62_v15 = vmax.f32 %v29_v12, 0.0  ;;  %v63_v16 = vmax.f32 %v30_v13, 0.0 }
  0x17   :  { %91 = vst [vmem:[#allocation5 + $0x10] sm:$0xff] %v58_v5  ;;  %v64_v17 = vmax.f32 %v31_v14, 0.0  ;;  %v32_v18 = vld [vmem:[#allocation2 + $0x48] sm:$0xff]  ;;  %v33_v19 = vld [vmem:[#allocation2 + $0x50] sm:$0xff]  ;;  %v34_v20 = vld [vmem:[#allocation2 + $0x58] sm:$0xff]  ;;  %s165_s0 = scalar_lea.vmem %s128_s21, 4224 }
  0x18   :  { %92 = vst [vmem:[#allocation5 + $0x18] sm:$0xff] %v59_v9  ;;  %93 = vst [vmem:[#allocation5 + $0x20] sm:$0xff] %v60_v10  ;;  %v65_v21 = vmax.f32 %v32_v18, 0.0  ;;  %v66_v22 = vmax.f32 %v33_v19, 0.0  ;;  %v67_v23 = vmax.f32 %v34_v20, 0.0  ;;  %v35_v24 = vld [vmem:[#allocation2 + $0x60] sm:$0xff]  ;;  %p166_p8 = scmp.ne.s32.totalorder %s128_s21, %s165_s0  ;;  %p171_p10 = scmp.lt.s32.totalorder %s165_s0, %s165_s0 }
  0x19   :  { %94 = vst [vmem:[#allocation5 + $0x28] sm:$0xff] %v61_v11  ;;  %v36_v25 = vld [vmem:[#allocation2 + $0x68] sm:$0xff]  ;;  %v37_v26 = vld [vmem:[#allocation2 + $0x70] sm:$0xff]  ;;  %95 = vst [vmem:[#allocation5 + $0x30] sm:$0xff] %v62_v15  ;;  %v68_v27 = vmax.f32 %v35_v24, 0.0 }
  0x1a   :  { %96 = vst [vmem:[#allocation5 + $0x38] sm:$0xff] %v63_v16  ;;  %97 = vst [vmem:[#allocation5 + $0x40] sm:$0xff] %v64_v17  ;;  %v69_v28 = vmax.f32 %v36_v25, 0.0  ;;  %v70_v29 = vmax.f32 %v37_v26, 0.0  ;;  %v38_v30 = vld [vmem:[#allocation2 + $0x78] sm:$0xff]  ;;  %v39_v31 = vld [vmem:[#allocation2 + $0x80] sm:$0xff]  ;;  %p172_p11 = por %p171_p10, %p170_p9 }
  0x1b   :  { %v40_v32 = vld [vmem:[#allocation2 + $0x88] sm:$0xff]  ;;  %98 = vst [vmem:[#allocation5 + $0x48] sm:$0xff] %v65_v21  ;;  %99 = vst [vmem:[#allocation5 + $0x50] sm:$0xff] %v66_v22  ;;  %v71_v33 = vmax.f32 %v38_v30, 0.0  ;;  %v72_v34 = vmax.f32 %v39_v31, 0.0  ;;  %v41_v36 = vld [vmem:[#allocation2 + $0x90] sm:$0xff] }
  0x1c   :  { %100 = vst [vmem:[#allocation5 + $0x58] sm:$0xff] %v67_v23  ;;  %v73_v35 = vmax.f32 %v40_v32, 0.0  ;;  %v42_v37 = vld [vmem:[#allocation2 + $0x98] sm:$0xff]  ;;  %v43_v38 = vld [vmem:[#allocation2 + $0xa0] sm:$0xff]  ;;  %101 = vst [vmem:[#allocation5 + $0x60] sm:$0xff] %v68_v27  ;;  %v74_v39 = vmax.f32 %v41_v36, 0.0  ;;  %p173_p12 = pnand %p172_p11, %p166_p8 }
  0x1d   :  { %102 = vst [vmem:[#allocation5 + $0x68] sm:$0xff] %v69_v28  ;;  %103 = vst [vmem:[#allocation5 + $0x70] sm:$0xff] %v70_v29  ;;  %v75_v40 = vmax.f32 %v42_v37, 0.0  ;;  %v76_v41 = vmax.f32 %v43_v38, 0.0  ;;  %v44_v42 = vld [vmem:[#allocation2 + $0xa8] sm:$0xff]  ;;  %v45_v43 = vld [vmem:[#allocation2 + $0xb0] sm:$0xff] }
  0x1e   :  { %v46_v44 = vld [vmem:[#allocation2 + $0xb8] sm:$0xff]  ;;  %104 = vst [vmem:[#allocation5 + $0x78] sm:$0xff] %v71_v33  ;;  %105 = vst [vmem:[#allocation5 + $0x80] sm:$0xff] %v72_v34  ;;  %v77_v45 = vmax.f32 %v44_v42, 0.0  ;;  %v78_v46 = vmax.f32 %v45_v43, 0.0  ;;  %v47_v48 = vld [vmem:[#allocation2 + $0xc0] sm:$0xff] }
  0x1f   :  { %106 = vst [vmem:[#allocation5 + $0x88] sm:$0xff] %v73_v35  ;;  %v79_v47 = vmax.f32 %v46_v44, 0.0  ;;  %v48_v49 = vld [vmem:[#allocation2 + $0xc8] sm:$0xff]  ;;  %v49_v50 = vld [vmem:[#allocation2 + $0xd0] sm:$0xff]  ;;  %107 = vst [vmem:[#allocation5 + $0x90] sm:$0xff] %v74_v39  ;;  %v80_v51 = vmax.f32 %v47_v48, 0.0 }
  0x20   :  { %108 = vst [vmem:[#allocation5 + $0x98] sm:$0xff] %v75_v40  ;;  %109 = vst [vmem:[#allocation5 + $0xa0] sm:$0xff] %v76_v41  ;;  %v81_v52 = vmax.f32 %v48_v49, 0.0  ;;  %v82_v53 = vmax.f32 %v49_v50, 0.0  ;;  %v50_v54 = vld [vmem:[#allocation2 + $0xd8] sm:$0xff]  ;;  %v51_v55 = vld [vmem:[#allocation2 + $0xe0] sm:$0xff] }
  0x21   :  { %v52_v56 = vld [vmem:[#allocation2 + $0xe8] sm:$0xff]  ;;  %110 = vst [vmem:[#allocation5 + $0xa8] sm:$0xff] %v77_v45  ;;  %111 = vst [vmem:[#allocation5 + $0xb0] sm:$0xff] %v78_v46  ;;  %v83_v57 = vmax.f32 %v50_v54, 0.0  ;;  %v84_v58 = vmax.f32 %v51_v55, 0.0  ;;  %v53_v60 = vld [vmem:[#allocation2 + $0xf0] sm:$0xff] }
  0x22   :  { %112 = vst [vmem:[#allocation5 + $0xb8] sm:$0xff] %v79_v47  ;;  %v85_v59 = vmax.f32 %v52_v56, 0.0  ;;  %v54_v61 = vld [vmem:[#allocation2 + $0xf8] sm:$0xff]  ;;  %v55_v62 = vld [vmem:[#allocation2 + $0x100] sm:$0xff]  ;;  %113 = vst [vmem:[#allocation5 + $0xc0] sm:$0xff] %v80_v51  ;;  %v86_v63 = vmax.f32 %v53_v60, 0.0 }
  0x23   :  { %114 = vst [vmem:[#allocation5 + $0xc8] sm:$0xff] %v81_v52  ;;  %115 = vst [vmem:[#allocation5 + $0xd0] sm:$0xff] %v82_v53  ;;  %v87_v0 = vmax.f32 %v54_v61, 0.0  ;;  %v88_v1 = vmax.f32 %v55_v62, 0.0 }
  0x24   :  { %116 = vst [vmem:[#allocation5 + $0xd8] sm:$0xff] %v83_v57  ;;  %117 = vst [vmem:[#allocation5 + $0xe0] sm:$0xff] %v84_v58 }
  0x25   :  { %118 = vst [vmem:[#allocation5 + $0xe8] sm:$0xff] %v85_v59  ;;  %119 = vst [vmem:[#allocation5 + $0xf0] sm:$0xff] %v86_v63 }
  0x26   :  { %120 = vst [vmem:[#allocation5 + $0xf8] sm:$0xff] %v87_v0  ;;  %121 = vst [vmem:[#allocation5 + $0x100] sm:$0xff] %v88_v1 }
  0x27   :  { %176 = shalt.err (!%p173_p12)
}
  0x28   :  { %s177_s24 = scalar_lea.hbm %s239_s1, 4224 }
  0x29   :  { %p178_p13 = scmp.ne.s32.totalorder %s239_s1, %s177_s24  ;;  %p181_p0 = scmp.lt.u32.totalorder %s177_s24, %s239_s1 }
  0x2b   :  { %p183_p1 = pnand %p181_p0, %p178_p13 }
  0x2d   :  { %186 = shalt.err (!%p183_p1)
}
  0x2e   :  { %133 = dma.vmem_to_hbm [thread:$0]  %s128_s21, 4224, %s239_s1, [#allocation4], %s192_s16, %s192_s16, %s193_s17  }
  0x2f   :  { %189 = dma.done.wait [#allocation4], 4224  }
  0x30   :  { %190 = vsyncadd [#allocation4], 4294963072 }
  0x31   :  { %137 = vsyncpa [#allocation3], 1 }
  0x32   :  { %138 = vsyncpa [#allocation4], 1 }

</bundles_post_ra>
